<compile_context>
chip_gen: v5e
topology: v5e:2x2
jax: 0.10.0
libtpu: 0.0.40
codegen_flags: <defaults>
</compile_context>

<pallas_src>
import functools

import jax
import jax.numpy as jnp
from jax.experimental import pallas as pl
from jax.experimental.pallas import tpu as pltpu


def _round_up(x, m):
    return ((x + m - 1) // m) * m


def _cdiv(a, b):
    return -(-a // b)


def _instance_norm_kernel(x_ref, o_ref, *, epsilon, hw):
    # x_ref: (row_tile, HW) block in VMEM; one row == one (n, c) instance.
    # The block's last dim is the full spatial extent, so the per-row stats
    # need no masking or padding correction.  Rows in a ragged tail block
    # compute on undefined data but their output writes are clipped by Pallas.
    x = x_ref[...].astype(jnp.float32)
    inv_hw = jnp.float32(1.0 / hw)

    mean = jnp.sum(x, axis=-1, keepdims=True) * inv_hw
    xc = x - mean
    # Biased variance (torch.mean of x*x over dims (2, 3)); two-pass form.
    var = jnp.sum(xc * xc, axis=-1, keepdims=True) * inv_hw
    inv = jax.lax.rsqrt(var + jnp.float32(epsilon))

    o_ref[...] = (xc * inv).astype(o_ref.dtype)


def _tpu_config():
    """Generation-aware (target block bytes, vmem limit, #TensorCores)."""
    vmem_cap = None
    try:
        info = pltpu.get_tpu_info()
        vmem_cap = getattr(info, "vmem_capacity_bytes", None)
    except Exception:
        vmem_cap = None
    if vmem_cap is None:
        vmem_cap = 64 * 1024 * 1024  # conservative default (v7x per-TC VMEM)

    if vmem_cap <= 96 * 1024 * 1024:
        # v7x-class: 64 MiB VMEM per TensorCore, 2 TensorCores per chip.
        return 2 * 1024 * 1024, 40 * 1024 * 1024, 2
    # v5e / v6e class: 128 MiB VMEM, single TensorCore.
    return 6 * 1024 * 1024, 64 * 1024 * 1024, 1


def instance_norm(x, epsilon=1e-8):
    """x: (N, C, H, W) array (NCHW, matching the PyTorch module)."""
    N, C, H, W = x.shape
    NC, HW = N * C, H * W

    itemsize = jnp.dtype(x.dtype).itemsize
    sublane = {4: 8, 2: 16, 1: 32}.get(itemsize, 8)

    target_block_bytes, vmem_limit, num_cores = _tpu_config()

    # Row-tile sizing: each block covers `row_tile` full (n, c) rows.  No
    # padded HBM copy is ever materialized.
    row_bytes_f32 = HW * 4
    nc_sub = _round_up(NC, sublane)
    row_cap = max(sublane, (target_block_bytes // row_bytes_f32) // sublane * sublane)
    row_cap = min(row_cap, nc_sub)
    num_blocks = _cdiv(NC, row_cap)
    if NC >= num_cores * sublane:
        # Enough rows: keep an even (multiple-of-#TC) block count so a 2-TC
        # chip splits the parallel axis without imbalance; 1 TC => no forcing.
        num_blocks = _round_up(max(num_blocks, num_cores), num_cores)

    if num_blocks == 1:
        row_tile = NC  # single block covering the full row dim (always legal)
    else:
        row_tile = _round_up(_cdiv(NC, num_blocks), sublane)
        num_blocks = _cdiv(NC, row_tile)  # drop any fully-OOB tail block

    # TODO(synk): for extremely large H*W (where even `sublane` rows of f32
    # exceed the per-block budget), add a second 'arbitrary' grid axis over
    # spatial chunks with sum/sumsq VMEM accumulators and a second normalize
    # pass instead of one block per full row.

    x2d = x.reshape(NC, HW)  # free for contiguous NCHW input

    kernel = functools.partial(_instance_norm_kernel, epsilon=float(epsilon), hw=HW)

    cost = pl.CostEstimate(
        flops=5 * NC * HW,
        transcendentals=NC,
        bytes_accessed=2 * NC * HW * itemsize,
    )

    out2d = pl.pallas_call(
        kernel,
        out_shape=jax.ShapeDtypeStruct((NC, HW), x.dtype),
        grid_spec=pltpu.PrefetchScalarGridSpec(
            num_scalar_prefetch=0,
            grid=(num_blocks,),
            in_specs=[pl.BlockSpec((row_tile, HW), lambda i: (i, 0))],
            out_specs=pl.BlockSpec((row_tile, HW), lambda i: (i, 0)),
        ),
        compiler_params=pltpu.CompilerParams(
            dimension_semantics=("parallel",),
            vmem_limit_bytes=vmem_limit,
        ),
        cost_estimate=cost,
    )(x2d)

    return out2d.reshape(N, C, H, W)


def _reference_instance_norm(x, epsilon=1e-8):
    x = x.astype(jnp.float32)
    mean = jnp.mean(x, axis=(2, 3), keepdims=True)
    xc = x - mean
    var = jnp.mean(xc * xc, axis=(2, 3), keepdims=True)
    return xc * jax.lax.rsqrt(var + epsilon)


if __name__ == "__main__":
    key = jax.random.PRNGKey(0)
    x = jax.random.normal(key, (2, 4, 16, 16), dtype=jnp.float32)

    out = jax.block_until_ready(instance_norm(x, epsilon=1e-8))
    ref = _reference_instance_norm(x, epsilon=1e-8)
    assert out.shape == x.shape
    assert jnp.allclose(out, ref, atol=1e-5, rtol=1e-5), "mismatch vs reference"

    # Ragged case: NC not a multiple of 8 and HW not a multiple of 128 —
    # exercised without any padded HBM copy.
    x2 = jax.random.normal(jax.random.PRNGKey(1), (3, 5, 9, 13), dtype=jnp.float32)
    out2 = jax.block_until_ready(instance_norm(x2))
    ref2 = _reference_instance_norm(x2)
    assert jnp.allclose(out2, ref2, atol=1e-5, rtol=1e-5), "mismatch (ragged case)"

    print("KERNEL_OK")
</pallas_src>

<mosaic_0001>
module attributes {stable_mosaic.version = 11 : i64} {
  func.func @_instance_norm_kernel(%arg0: i32, %arg1: memref<8x256xf32, #tpu.memory_space<vmem>>, %arg2: memref<8x256xf32, #tpu.memory_space<vmem>>) attributes {dimension_semantics = [#tpu.dimension_semantics<parallel>], iteration_bounds = array<i64: 1>, scalar_prefetch = 0 : i64, scratch_operands = 0 : i64, tpu.core_type = #tpu.core_type<tc>, window_params = [{transform_indices = @transform_0, window_bounds = array<i64: 8, 256>}, {transform_indices = @transform_1, window_bounds = array<i64: 8, 256>}]} {
    %c0 = arith.constant 0 : index
    %c0_0 = arith.constant 0 : index
    %0 = vector.load %arg1[%c0, %c0_0] : memref<8x256xf32, #tpu.memory_space<vmem>>, vector<8x256xf32>
    %cst = arith.constant dense<0.000000e+00> : vector<8xf32>
    %1 = vector.multi_reduction <add>, %0, %cst [1] : vector<8x256xf32> to vector<8xf32>
    %2 = vector.shape_cast %1 : vector<8xf32> to vector<8x1xf32>
    %cst_1 = arith.constant 3.906250e-03 : f32
    %3 = vector.broadcast %cst_1 : f32 to vector<8x1xf32>
    %4 = arith.mulf %2, %3 : vector<8x1xf32>
    %5 = vector.broadcast %4 : vector<8x1xf32> to vector<8x256xf32>
    %6 = arith.subf %0, %5 : vector<8x256xf32>
    %7 = arith.mulf %6, %6 : vector<8x256xf32>
    %cst_2 = arith.constant dense<0.000000e+00> : vector<8xf32>
    %8 = vector.multi_reduction <add>, %7, %cst_2 [1] : vector<8x256xf32> to vector<8xf32>
    %9 = vector.shape_cast %8 : vector<8xf32> to vector<8x1xf32>
    %cst_3 = arith.constant 3.906250e-03 : f32
    %10 = vector.broadcast %cst_3 : f32 to vector<8x1xf32>
    %11 = arith.mulf %9, %10 : vector<8x1xf32>
    %cst_4 = arith.constant 9.99999993E-9 : f32
    %12 = vector.broadcast %cst_4 : f32 to vector<8x1xf32>
    %13 = arith.addf %11, %12 : vector<8x1xf32>
    %14 = math.rsqrt %13 : vector<8x1xf32>
    %15 = vector.broadcast %14 : vector<8x1xf32> to vector<8x256xf32>
    %16 = arith.mulf %6, %15 : vector<8x256xf32>
    %c0_5 = arith.constant 0 : index
    %c0_6 = arith.constant 0 : index
    %17 = vector.load %arg2[%c0_5, %c0_6] : memref<8x256xf32, #tpu.memory_space<vmem>>, vector<8x256xf32>
    tpu.vector_store %arg2[%c0_5, %c0_6], %16 {strides = array<i32>} : memref<8x256xf32, #tpu.memory_space<vmem>>, vector<8x256xf32>,
    return
  }
  func.func @transform_0(%arg0: i32) -> (i32, i32) {
    %c0_i32 = arith.constant 0 : i32
    %c0_i32_0 = arith.constant 0 : i32
    return %arg0, %c0_i32 : i32, i32
  }
  func.func @transform_1(%arg0: i32) -> (i32, i32) {
    %c0_i32 = arith.constant 0 : i32
    %c0_i32_0 = arith.constant 0 : i32
    return %arg0, %c0_i32 : i32, i32
  }
}

</mosaic_0001>

<bundles_post_ra>
// kernel: tpu_custom_call.1
= control target key start
LH: loop header
LB: loop body
LE: loop exit
PB: predicated region body
PF: predicated region fallthrough
CT: control target
= control target key end

     0   :  { %6 = vsyncpa [#allocation3], 0  ;;  %s143_s0 = inlined_call_operand.hbm [shape: f32[8,256], index: 0, kind: input, shape index: {}]   ;;  %s144_s1 = inlined_call_operand.hbm [shape: f32[8,256], index: 1, kind: output, shape index: {}]  }
   0x1   :  { %7 = vsyncpa [#allocation4], 0  ;;  %s13_s8 = sshll.u32 %s143_s0, 4  ;;  %s125_s9 = smov [#allocation2]   ;;  %s14_s8 = int_to_ptr.hbm [resolvable:$true] %s13_s8 }
   0x2   :  { %s15_s10 = sshll.u32 %s125_s9, 4  ;;  %s16_s10 = int_to_ptr.vmem [resolvable:$true] %s15_s10 }
   0x3   :  { %18 = dma.hbm_to_vmem [thread:$0]  %s14_s8, 256, %s16_s10, [#allocation3]  }
   0x4   :  { %121 = dma.done.wait [#allocation3], 256  }
   0x5   :  { %122 = vsyncadd [#allocation3], 4294967040  ;;  %v23_v0 = vld [vmem:[#allocation2] sm:$0xff]  ;;  %v24_v1 = vld [vmem:[#allocation2 + $0x8] sm:$0xff]  ;;  %s126_s0 = smov [#allocation5]   ;;  %s59_s14 = sshll.u32 %s144_s1, 4  ;;  %s60_s14 = int_to_ptr.hbm [resolvable:$true] %s59_s14 }
   0x6   :  { %v25_v2 = vadd.f32 %v24_v1, %v23_v0  ;;  %s57_s11 = sshll.u32 %s126_s0, 4  ;;  %s58_s11 = int_to_ptr.vmem [resolvable:$true] %s57_s11 }
   0x8   :  { %26 = vadd.xlane.f32.xlu0 %v25_v2 }
  0x7b   :  { %v27_v3 = vpop.xlane.xlu0 %26 }
  0x7c   :  { %v28_v4 = vmul.f32 0.00390625, %v27_v3 }
  0x7e   :  { %v29_v5 = vsub.f32 %v23_v0, %v28_v4  ;;  %v30_v6 = vsub.f32 %v24_v1, %v28_v4 }
  0x80   :  { %v31_v7 = vmul.f32 %v29_v5, %v29_v5  ;;  %v32_v8 = vmul.f32 %v30_v6, %v30_v6 }
  0x82   :  { %v33_v9 = vadd.f32 %v32_v8, %v31_v7 }
  0x84   :  { %34 = vadd.xlane.f32.xlu0 %v33_v9 }
  0xf7   :  { %v35_v10 = vpop.xlane.xlu0 %34 }
  0xf8   :  { %v36_v11 = vmul.f32 0.00390625, %v35_v10 }
  0xfa   :  { %v37_v12 = vadd.f32 1e-08, %v36_v11 }
  0xfc   :  { %71 = vrsqrt.f32 %v37_v12  ;;  %vm44_vm1 = vweird.f32 %v37_v12 }
 0x102   :  { %v72_v13 = vpop.eup %71 }
 0x103   :  { %v39_v14 = vmul.f32 %v72_v13, %v37_v12  ;;  %vm45_vm0 = vweird.f32 %v72_v13 }
 0x104   :  { %vm46_vm2 = vmor %vm44_vm1, %vm45_vm0 }
 0x105   :  { %v40_v15 = vmul.f32 %v72_v13, %v39_v14 }
 0x107   :  { %v41_v16 = vmul.f32 0.5, %v40_v15 }
 0x109   :  { %v42_v17 = vsub.f32 1.5, %v41_v16 }
 0x10b   :  { %v43_v18 = vmul.f32 %v72_v13, %v42_v17 }
 0x10d   :  { %v47_v19 = vsel %vm46_vm2, %v72_v13, %v43_v18 }
 0x10e   :  { %v48_v20 = vmul.f32 %v47_v19, %v29_v5  ;;  %v49_v21 = vmul.f32 %v47_v19, %v30_v6 }
 0x110   :  { %50 = vst [vmem:[#allocation5] sm:$0xff] %v48_v20 }
 0x111   :  { %51 = vst [vmem:[#allocation5 + $0x8] sm:$0xff] %v49_v21 }
 0x112   :  { %62 = dma.vmem_to_hbm [thread:$0]  %s58_s11, 256, %s60_s14, [#allocation4]  }
 0x113   :  { %123 = dma.done.wait [#allocation4], 256  }
 0x114   :  { %124 = vsyncadd [#allocation4], 4294967040 }
 0x115   :  { %67 = vsyncpa [#allocation3], 1 }
 0x116   :  { %68 = vsyncpa [#allocation4], 1 }

</bundles_post_ra>
